<compile_context>
chip_gen: v6e
topology: v6e:2x2x1
jax: 0.10.0
libtpu: 0.0.40
codegen_flags: <defaults>
</compile_context>

<pallas_src>
import jax
import jax.numpy as jnp
from jax.experimental import pallas as pl
from jax.experimental.pallas import tpu as pltpu


def _round_up(x, m):
    return (x + m - 1) // m * m


def _pick_tile(padded_dim, max_tile):
    """Largest multiple of 128 that divides `padded_dim` and is <= max_tile."""
    t = max(128, (min(max_tile, padded_dim) // 128) * 128)
    while padded_dim % t:
        t -= 128
    return t


# --------------------------- fused kernel -----------------------------------
def _mlp_skip_g_kernel(x_ref, att_ref, w1_ref, b1_ref, w2_ref, b2_ref,
                       wsk_ref, bsk_ref, o_ref):
    # fc1 + LeakyReLU(0.2).  W1/b1 blocks are grid-invariant -> VMEM-resident.
    w1 = w1_ref[...].astype(jnp.float32)
    z = jnp.dot(x_ref[...], w1, preferred_element_type=jnp.float32) + b1_ref[...]
    h = jnp.maximum(z, 0.2 * z)                    # LeakyReLU, single VALU max

    # fc2 + ReLU (f32 accumulation / epilogue).
    w2 = w2_ref[...].astype(jnp.float32)
    main = jnp.dot(h, w2, preferred_element_type=jnp.float32) + b2_ref[...]
    main = jnp.maximum(main, 0.0)

    # fc_skip.
    wsk = wsk_ref[...].astype(jnp.float32)
    skip = jnp.dot(att_ref[...], wsk,
                   preferred_element_type=jnp.float32) + bsk_ref[...]

    o_ref[...] = (main + skip).astype(o_ref.dtype)


def mlp_skip_g_forward(noise, att, params, *, tile_b=256, tile_n=128,
                       weight_dtype=jnp.bfloat16):
    """Forward pass of MLP_SKIP_G as one fused Pallas kernel.

    params (all already [in, out] layout, i.e. transposed vs. torch Linear):
        w1: [nz + attSize, ngh], b1: [ngh]
        w2: [ngh, resSize],      b2: [resSize]
        w_skip: [attSize, resSize], b_skip: [resSize]
    Rows 0..nz-1 of w1 multiply noise, rows nz.. multiply att (same order as
    torch.cat((noise, att), 1)).
    """
    B, nz = noise.shape
    _, att_size = att.shape
    w1, b1 = params["w1"], params["b1"]
    w2, b2 = params["w2"], params["b2"]
    wsk, bsk = params["w_skip"], params["b_skip"]
    kin = nz + att_size
    ngh = w1.shape[1]
    res = w2.shape[1]
    out_dtype = noise.dtype
    f32 = jnp.float32

    # Lane-dense padded dims FIRST (minimal x128 padding), then divisor tiles.
    nghp = _round_up(ngh, 128)
    resp = _round_up(res, 128)
    TN = _pick_tile(resp, tile_n)
    TB = min(tile_b, _round_up(B, 8))
    Bp = _round_up(B, TB)

    # Fold torch.cat((noise, att), 1) into one operand; zero-pad rows.
    x = jnp.concatenate([noise.astype(f32), att.astype(f32)], axis=1)
    x = jnp.pad(x, ((0, Bp - B), (0, 0)))
    att_p = jnp.pad(att.astype(f32), ((0, Bp - B), (0, 0)))

    # Weight streams in bf16 (DMA-bound small-batch regime); biases stay f32.
    w1_p = jnp.pad(w1, ((0, 0), (0, nghp - ngh))).astype(weight_dtype)
    b1_p = jnp.pad(b1, (0, nghp - ngh)).astype(f32).reshape(1, nghp)
    w2_p = jnp.pad(w2, ((0, nghp - ngh), (0, resp - res))).astype(weight_dtype)
    b2_p = jnp.pad(b2, (0, resp - res)).astype(f32).reshape(1, resp)
    wsk_p = jnp.pad(wsk, ((0, 0), (0, resp - res))).astype(weight_dtype)
    bsk_p = jnp.pad(bsk, (0, resp - res)).astype(f32).reshape(1, resp)

    wbytes = jnp.dtype(weight_dtype).itemsize
    cost = pl.CostEstimate(
        flops=2 * Bp * (kin * nghp + nghp * resp + att_size * resp),
        transcendentals=0,
        bytes_accessed=(4 * (Bp * kin + Bp * att_size + nghp + 2 * resp
                             + Bp * resp)
                        + wbytes * (kin * nghp + nghp * resp
                                    + att_size * resp)))

    out = pl.pallas_call(
        _mlp_skip_g_kernel,
        out_shape=jax.ShapeDtypeStruct((Bp, resp), out_dtype),
        grid_spec=pltpu.PrefetchScalarGridSpec(
            num_scalar_prefetch=0,
            grid=(Bp // TB, resp // TN),
            in_specs=[
                pl.BlockSpec((TB, kin), lambda i, j: (i, 0)),        # x
                pl.BlockSpec((TB, att_size), lambda i, j: (i, 0)),   # att
                pl.BlockSpec((kin, nghp), lambda i, j: (0, 0)),      # W1
                pl.BlockSpec((1, nghp), lambda i, j: (0, 0)),        # b1
                pl.BlockSpec((nghp, TN), lambda i, j: (0, j)),       # W2
                pl.BlockSpec((1, TN), lambda i, j: (0, j)),          # b2
                pl.BlockSpec((att_size, TN), lambda i, j: (0, j)),   # Wskip
                pl.BlockSpec((1, TN), lambda i, j: (0, j)),          # bskip
            ],
            out_specs=pl.BlockSpec((TB, TN), lambda i, j: (i, j)),
        ),
        compiler_params=pltpu.CompilerParams(
            dimension_semantics=("parallel", "parallel")),
        cost_estimate=cost,
    )(x, att_p, w1_p, b1_p, w2_p, b2_p, wsk_p, bsk_p)

    return out[:B, :res]


# --------------------------- reference --------------------------------------
def _reference(noise, att, params, weight_dtype=jnp.bfloat16):
    """f32 reference using the same (bf16-rounded) weight values as the kernel."""
    f32 = jnp.float32
    w1 = params["w1"].astype(weight_dtype).astype(f32)
    w2 = params["w2"].astype(weight_dtype).astype(f32)
    wsk = params["w_skip"].astype(weight_dtype).astype(f32)
    x = jnp.concatenate([noise, att], axis=1).astype(f32)
    z = x @ w1 + params["b1"]
    h = jnp.where(z > 0, z, 0.2 * z)
    h2 = jnp.maximum(h @ w2 + params["b2"], 0.0)
    skip = att.astype(f32) @ wsk + params["b_skip"]
    return h2 + skip


if __name__ == "__main__":
    # Small shapes consistent with the module:
    #   opt.nz = 16, opt.attSize = 32, opt.ngh = 300, opt.resSize = 200
    B, nz, att_size, ngh, res = 8, 16, 32, 300, 200

    key = jax.random.PRNGKey(0)
    k_w1, k_w2, k_ws, k_noise, k_att = jax.random.split(key, 5)

    # weights_init: Linear weights ~ N(0, 0.02), biases = 0.
    params = {
        "w1": 0.02 * jax.random.normal(k_w1, (nz + att_size, ngh), jnp.float32),
        "b1": jnp.zeros((ngh,), jnp.float32),
        "w2": 0.02 * jax.random.normal(k_w2, (ngh, res), jnp.float32),
        "b2": jnp.zeros((res,), jnp.float32),
        "w_skip": 0.02 * jax.random.normal(k_ws, (att_size, res), jnp.float32),
        "b_skip": jnp.zeros((res,), jnp.float32),
    }
    noise = jax.random.normal(k_noise, (B, nz), jnp.float32)
    att = jax.random.normal(k_att, (B, att_size), jnp.float32)

    out = jax.block_until_ready(mlp_skip_g_forward(noise, att, params))
    ref = _reference(noise, att, params)

    assert out.shape == (B, res)
    err = float(jnp.max(jnp.abs(out - ref)))
    assert jnp.allclose(out, ref, atol=1e-4, rtol=1e-4), err

    print("KERNEL_OK")
</pallas_src>

<mosaic_0001>
module attributes {stable_mosaic.version = 11 : i64} {
  func.func @_mlp_skip_g_kernel(%arg0: i32, %arg1: i32, %arg2: memref<8x48xf32, #tpu.memory_space<vmem>>, %arg3: memref<8x32xf32, #tpu.memory_space<vmem>>, %arg4: memref<48x384xbf16, #tpu.memory_space<vmem>>, %arg5: memref<1x384xf32, #tpu.memory_space<vmem>>, %arg6: memref<384x128xbf16, #tpu.memory_space<vmem>>, %arg7: memref<1x128xf32, #tpu.memory_space<vmem>>, %arg8: memref<32x128xbf16, #tpu.memory_space<vmem>>, %arg9: memref<1x128xf32, #tpu.memory_space<vmem>>, %arg10: memref<8x128xf32, #tpu.memory_space<vmem>>) attributes {dimension_semantics = [#tpu.dimension_semantics<parallel>, #tpu.dimension_semantics<parallel>], iteration_bounds = array<i64: 1, 2>, scalar_prefetch = 0 : i64, scratch_operands = 0 : i64, tpu.core_type = #tpu.core_type<tc>, window_params = [{transform_indices = @transform_0, window_bounds = array<i64: 8, 48>}, {transform_indices = @transform_1, window_bounds = array<i64: 8, 32>}, {pipeline_mode = #tpu.pipeline_mode<synchronous>, transform_indices = @transform_2, window_bounds = array<i64: 48, 384>}, {pipeline_mode = #tpu.pipeline_mode<synchronous>, transform_indices = @transform_3, window_bounds = array<i64: 1, 384>}, {transform_indices = @transform_4, window_bounds = array<i64: 384, 128>}, {transform_indices = @transform_5, window_bounds = array<i64: 1, 128>}, {transform_indices = @transform_6, window_bounds = array<i64: 32, 128>}, {transform_indices = @transform_7, window_bounds = array<i64: 1, 128>}, {transform_indices = @transform_8, window_bounds = array<i64: 8, 128>}]} {
    %c0 = arith.constant 0 : index
    %c0_0 = arith.constant 0 : index
    %0 = vector.load %arg4[%c0, %c0_0] : memref<48x384xbf16, #tpu.memory_space<vmem>>, vector<48x384xbf16>
    %1 = arith.extf %0 : vector<48x384xbf16> to vector<48x384xf32>
    %c0_1 = arith.constant 0 : index
    %c0_2 = arith.constant 0 : index
    %2 = vector.load %arg2[%c0_1, %c0_2] : memref<8x48xf32, #tpu.memory_space<vmem>>, vector<8x48xf32>
    %cst = arith.constant dense<0.000000e+00> : vector<8x384xf32>
    %3 = tpu.matmul %2, %1, %cst {dimension_numbers = #tpu.dot_dimension_numbers<[1], [0], [0], [1], [0, 0, 1, 1], [], []>} : vector<8x48xf32>, vector<48x384xf32>, vector<8x384xf32> -> vector<8x384xf32>
    %c0_3 = arith.constant 0 : index
    %c0_4 = arith.constant 0 : index
    %4 = vector.load %arg5[%c0_3, %c0_4] : memref<1x384xf32, #tpu.memory_space<vmem>>, vector<1x384xf32>
    %5 = vector.broadcast %4 : vector<1x384xf32> to vector<8x384xf32>
    %6 = arith.addf %3, %5 : vector<8x384xf32>
    %cst_5 = arith.constant 2.000000e-01 : f32
    %7 = vector.broadcast %cst_5 : f32 to vector<8x384xf32>
    %8 = arith.mulf %7, %6 : vector<8x384xf32>
    %9 = arith.maximumf %6, %8 : vector<8x384xf32>
    %c0_6 = arith.constant 0 : index
    %c0_7 = arith.constant 0 : index
    %10 = vector.load %arg6[%c0_6, %c0_7] : memref<384x128xbf16, #tpu.memory_space<vmem>>, vector<384x128xbf16>
    %11 = arith.extf %10 : vector<384x128xbf16> to vector<384x128xf32>
    %cst_8 = arith.constant dense<0.000000e+00> : vector<8x128xf32>
    %12 = tpu.matmul %9, %11, %cst_8 {dimension_numbers = #tpu.dot_dimension_numbers<[1], [0], [0], [1], [0, 0, 1, 1], [], []>} : vector<8x384xf32>, vector<384x128xf32>, vector<8x128xf32> -> vector<8x128xf32>
    %c0_9 = arith.constant 0 : index
    %c0_10 = arith.constant 0 : index
    %13 = vector.load %arg7[%c0_9, %c0_10] : memref<1x128xf32, #tpu.memory_space<vmem>>, vector<1x128xf32>
    %14 = vector.broadcast %13 : vector<1x128xf32> to vector<8x128xf32>
    %15 = arith.addf %12, %14 : vector<8x128xf32>
    %cst_11 = arith.constant 0.000000e+00 : f32
    %16 = vector.broadcast %cst_11 : f32 to vector<8x128xf32>
    %17 = arith.maximumf %15, %16 : vector<8x128xf32>
    %c0_12 = arith.constant 0 : index
    %c0_13 = arith.constant 0 : index
    %18 = vector.load %arg8[%c0_12, %c0_13] : memref<32x128xbf16, #tpu.memory_space<vmem>>, vector<32x128xbf16>
    %19 = arith.extf %18 : vector<32x128xbf16> to vector<32x128xf32>
    %c0_14 = arith.constant 0 : index
    %c0_15 = arith.constant 0 : index
    %20 = vector.load %arg3[%c0_14, %c0_15] : memref<8x32xf32, #tpu.memory_space<vmem>>, vector<8x32xf32>
    %cst_16 = arith.constant dense<0.000000e+00> : vector<8x128xf32>
    %21 = tpu.matmul %20, %19, %cst_16 {dimension_numbers = #tpu.dot_dimension_numbers<[1], [0], [0], [1], [0, 0, 1, 1], [], []>} : vector<8x32xf32>, vector<32x128xf32>, vector<8x128xf32> -> vector<8x128xf32>
    %c0_17 = arith.constant 0 : index
    %c0_18 = arith.constant 0 : index
    %22 = vector.load %arg9[%c0_17, %c0_18] : memref<1x128xf32, #tpu.memory_space<vmem>>, vector<1x128xf32>
    %23 = vector.broadcast %22 : vector<1x128xf32> to vector<8x128xf32>
    %24 = arith.addf %21, %23 : vector<8x128xf32>
    %25 = arith.addf %17, %24 : vector<8x128xf32>
    %c0_19 = arith.constant 0 : index
    %c0_20 = arith.constant 0 : index
    %26 = vector.load %arg10[%c0_19, %c0_20] : memref<8x128xf32, #tpu.memory_space<vmem>>, vector<8x128xf32>
    tpu.vector_store %arg10[%c0_19, %c0_20], %25 {strides = array<i32>} : memref<8x128xf32, #tpu.memory_space<vmem>>, vector<8x128xf32>,
    return
  }
  func.func @transform_0(%arg0: i32, %arg1: i32) -> (i32, i32) {
    %c0_i32 = arith.constant 0 : i32
    %c0_i32_0 = arith.constant 0 : i32
    return %arg0, %c0_i32 : i32, i32
  }
  func.func @transform_1(%arg0: i32, %arg1: i32) -> (i32, i32) {
    %c0_i32 = arith.constant 0 : i32
    %c0_i32_0 = arith.constant 0 : i32
    return %arg0, %c0_i32 : i32, i32
  }
  func.func @transform_2(%arg0: i32, %arg1: i32) -> (i32, i32) {
    %c0_i32 = arith.constant 0 : i32
    %c0_i32_0 = arith.constant 0 : i32
    %c0_i32_1 = arith.constant 0 : i32
    return %c0_i32, %c0_i32_0 : i32, i32
  }
  func.func @transform_3(%arg0: i32, %arg1: i32) -> (i32, i32) {
    %c0_i32 = arith.constant 0 : i32
    %c0_i32_0 = arith.constant 0 : i32
    %c0_i32_1 = arith.constant 0 : i32
    return %c0_i32, %c0_i32_0 : i32, i32
  }
  func.func @transform_4(%arg0: i32, %arg1: i32) -> (i32, i32) {
    %c0_i32 = arith.constant 0 : i32
    %c0_i32_0 = arith.constant 0 : i32
    return %c0_i32, %arg1 : i32, i32
  }
  func.func @transform_5(%arg0: i32, %arg1: i32) -> (i32, i32) {
    %c0_i32 = arith.constant 0 : i32
    %c0_i32_0 = arith.constant 0 : i32
    return %c0_i32, %arg1 : i32, i32
  }
  func.func @transform_6(%arg0: i32, %arg1: i32) -> (i32, i32) {
    %c0_i32 = arith.constant 0 : i32
    %c0_i32_0 = arith.constant 0 : i32
    return %c0_i32, %arg1 : i32, i32
  }
  func.func @transform_7(%arg0: i32, %arg1: i32) -> (i32, i32) {
    %c0_i32 = arith.constant 0 : i32
    %c0_i32_0 = arith.constant 0 : i32
    return %c0_i32, %arg1 : i32, i32
  }
  func.func @transform_8(%arg0: i32, %arg1: i32) -> (i32, i32) {
    %c0_i32 = arith.constant 0 : i32
    return %arg0, %arg1 : i32, i32
  }
}

</mosaic_0001>

<bundles_post_ra>
// kernel: tpu_custom_call.1
= control target key start
LH: loop header
LB: loop body
LE: loop exit
PB: predicated region body
PF: predicated region fallthrough
CT: control target
= control target key end

     0   :  { %s2119_s0 = inlined_call_operand.hbm [shape: f32[8,48], index: 0, kind: input, shape index: {}]   ;;  %s2120_s1 = inlined_call_operand.hbm [shape: f32[8,32], index: 1, kind: input, shape index: {}]   ;;  %s2121_s2 = inlined_call_operand.hbm [shape: bf16[48,384], index: 2, kind: input, shape index: {}]   ;;  %s2122_s3 = inlined_call_operand.vmem [shape: f32[1,384], index: 3, kind: input, shape index: {}]   ;;  %s2123_s4 = inlined_call_operand.hbm [shape: bf16[384,256], index: 4, kind: input, shape index: {}]   ;;  %s2124_s5 = inlined_call_operand.vmem [shape: f32[1,256], index: 5, kind: input, shape index: {}]   ;;  %s2125_s6 = inlined_call_operand.hbm [shape: bf16[32,256], index: 6, kind: input, shape index: {}]   ;;  %s2126_s7 = inlined_call_operand.vmem [shape: f32[1,256], index: 7, kind: input, shape index: {}]   ;;  %s2127_s8 = inlined_call_operand.hbm [shape: f32[8,256], index: 8, kind: output, shape index: {}]  }
   0x1   :  { %2140 = sst [smem:[#allocation23_spill]] %s2120_s1 }
   0x2   :  { %2141 = sst [smem:[#allocation24_spill]] %s2123_s4 }
   0x3   :  { %2142 = sst [smem:[#allocation25_spill]] %s2126_s7 }
   0x4   :  { %2143 = sst [smem:[#allocation26_spill]] %s2127_s8 }
   0x5   :  { %13 = vsyncpa [#allocation3], 0 }
   0x6   :  { %14 = vsyncpa [#allocation6], 0 }
   0x7   :  { %15 = vsyncpa [#allocation9], 0 }
   0x8   :  { %17 = vsyncpa [#allocation9 + $0x1], 0 }
   0x9   :  { %18 = vsyncpa [#allocation4], 0 }
   0xa   :  { %20 = vsyncpa [#allocation4 + $0x1], 0  ;;  %s1826_s27 = smov 0   ;;  %s1828_s28 = smov 0  }
   0xb   :  { %s1830_s29 = smov 0   ;;  %s1832_s30 = smov 0  }
   0xc   :  { %s1834_s9 = smov 0   ;;  %s1836_s10 = smov 0  }
   0xd LB: > { %2144 = sst [smem:[#allocation16_spill]] %s1746_s27  ;;  %s1857_s11 = sadd.s32 4294967295, %s1766_s10   ;;  %s1766_s10 = sphi %s1836_s10, %s26_s10   ;;  %s1762_s9 = sphi %s1834_s9, %s2181_s9   ;;  %s1758_s30 = sphi %s1832_s30, %s2180_s30   ;;  %s1754_s29 = sphi %s1830_s29, %s2176_s29   ;;  %s1750_s28 = sphi %s1828_s28, %s2179_s28   ;;  %s1746_s27 = sphi %s1826_s27, %s2178_s27  }
   0xe   : > { %2145 = sst [smem:[#allocation17_spill]] %s1754_s29  ;;  %s1160_s12 = sadd.s32 4294967294, %s1766_s10  }
   0xf   : > { %2146 = sst [smem:[#allocation18_spill]] %s1766_s10  ;;  %p146_p0 = scmp.ne.s32.totalorder %s1754_s29, %s1750_s28 }
  0x10   : > { %p147_p1 = scmp.eq.s32.totalorder %s1766_s10, 0  ;;  %p152_p2 = scmp.ne.s32.totalorder %s1750_s28, %s1746_s27 }
  0x11   : > { %p2138_p3 = scmp.eq.s32.totalorder %s1857_s11, 0  ;;  %p256_p4 = scmp.eq.s32.totalorder %s1857_s11, 1 }
  0x12   : > { %p1868_p5 = por %p147_p1, %p146_p0  ;;  %p262_p6 = scmp.eq.s32.totalorder %s1160_s12, 1 }
  0x13   : > { %p1874_p7 = por %p2138_p3, %p152_p2  ;;  %p1878_p8 = por %p256_p4, %p146_p0 }
  0x14   : > { %p1882_p9 = por %p262_p6, %p152_p2  ;;  %p1161_p10 = scmp.ge.s32.totalorder %s1766_s10, 1 }
  0x15   : > { %s2149_s16 = scalar_select %p1878_p8, 1, 0 }
  0x16   : > { %s2151_s17 = scalar_select %p1882_p9, 1, 0 }
  0x17   : > { %2150 = sst [smem:[#allocation19_spill]] %s2149_s16  ;;  %p269_p11 = scmp.lt.s32.totalorder %s1766_s10, 3 }
  0x18   : > { %2152 = sst [smem:[#allocation20_spill]] %s2151_s17  ;;  %s1768_s19 = smov [#allocation5]  }
  0x19   : > { %p1889_p13 = pnand %p1161_p10, %p269_p11  ;;  %s297_s20 = sshll.u32 %s1768_s19, 4  ;;  %s298_s20 = int_to_ptr.vmem [resolvable:$true] %s297_s20 }
  0x1a   : > { %p1481_p1 = scmp.lt.s32.totalorder %s1766_s10, 2  ;;  %s35_s23 = sadd.s32 1, %s1762_s9 }
  0x1b   : > { %p1457_p0 = pneg %p1889_p13  ;;  %p36_p6 = scmp.ge.s32.totalorder %s35_s23, 2 }
  0x1c   : > { %p1898_p4 = pnand %p1481_p1, %p1868_p5  ;;  %s324_s24 = sand.u32 1, %s1766_s10  }
  0x1d   : > { %p1904_p2 = pnand %p1457_p0, %p2138_p3  ;;  %s1555_s25 = scalar_lea.vmem %s298_s20, 128 }
  0x1e   : > { %p1556_p11 = scmp.ne.s32.totalorder %s298_s20, %s1555_s25  ;;  %p1563_p12 = scmp.lt.s32.totalorder %s298_s20, %s298_s20 }
  0x1f   : > { %p1546_p10 = pneg %p1904_p2  ;;  %p1564_p9 = scmp.lt.s32.totalorder %s1555_s25, %s1555_s25 }
  0x21   : > { %p1558_p5 = pnand %p1556_p11, %p1546_p10  ;;  %p1565_p8 = por %p1564_p9, %p1563_p12 }
  0x23   : > { %p1559_p1 = pneg %p1558_p5 }
  0x25   : > { %p1566_p0 = pnand %p1565_p8, %p1559_p1 }
  0x27   : > { %1569 = shalt.err (!%p1566_p0)
}
  0x28   : > { %s2156_s1 = sld [smem:[#allocation23_spill]]  ;;  %s2183_s23 = smov (%p36_p6, %s35_s23), 0 }
  0x29   : > { %2157 = sst [smem:[#allocation21_spill]] %s2183_s23  ;;  %s326_s14 = sand.u32 1, %s1754_s29  }
  0x2a   : > { %s136_s19 = ssub.s32 %s1762_s9, %s2183_s23  ;;  %s1437_s25 = smul.u32 192, %s326_s14 }
  0x2b   : > { %p137_p8 = scmp.eq.s32.totalorder %s136_s19, 0  ;;  %s1166_s13 = sshll.u32 %s1762_s9, 6 }
  0x2c   : > { %s2158_s4 = sld [smem:[#allocation24_spill]]  ;;  %s2159_s17 = sadd.s32 1, %s1754_s29 }
  0x2d   : > { %s1934_s27 = scalar_select %p137_p8, %s1754_s29, %s2159_s17  }
  0x2e   : > { %1463 = dma.hbm_to_vmem [thread:$0]  (!%p1904_p2), %s2156_s1, 128, %s298_s20, [#allocation6]  }
  0x2f   : > { %2160 = sst [smem:[#allocation22_spill]] %s1934_s27  ;;  %s328_s8 = scalar_lea.vmem [#allocation8], %s1437_s25 }
  0x30   : > { %s334_s16 = sshll.u32 %s328_s8, 4  ;;  %s1167_s20 = sshll.u32 %s326_s14, 4  ;;  %s335_s16 = int_to_ptr.vmem [resolvable:$true] %s334_s16 }
  0x31   : > { %s1936_s1 = scalar_lea.sflag [#allocation9], %s324_s24  ;;  %p2139_p9 = pneg %p1898_p4 }
  0x32   : > { %s333_s12 = scalar_lea.hbm %s2158_s4, %s1166_s13  ;;  %s1583_s23 = scalar_lea.vmem %s335_s16, 3072 }
  0x33   : > { %p1584_p12 = scmp.ne.s32.totalorder %s335_s16, %s1583_s23  ;;  %s1769_s19 = smov [#allocation8]  }
  0x34   : > { %s1588_s10 = sshll.u32 %s1769_s19, 4  ;;  %s1589_s10 = int_to_ptr.vmem [resolvable:$false] %s1588_s10 }
  0x35   : > { %p1586_p6 = pnand %p1584_p12, %p2139_p9  ;;  %s1590_s26 = scalar_lea.vmem %s1589_s10, 6144 }
  0x36   : > { %p1591_p5 = scmp.lt.s32.totalorder %s335_s16, %s1589_s10  ;;  %p1592_p1 = scmp.lt.s32.totalorder %s1590_s26, %s1583_s23 }
  0x37   : > { %p1587_p11 = pneg %p1586_p6 }
  0x38   : > { %p1593_p0 = por %p1592_p1, %p1591_p5 }
  0x3a   : > { %p1594_p8 = pnand %p1593_p0, %p1587_p11 }
  0x3c   : > { %1597 = shalt.err (!%p1594_p8)
}
  0x3d   : > { %s1770_s8 = smov 128   ;;  %s1771_s17 = smov 64  }
  0x3e   : > { %s1772_s24 = smov 4   ;;  %s1954_s23 = scalar_lea.hbm %s2125_s6, %s1166_s13 }
  0x3f   : > { %1470 = dma.hbm_to_vmem [thread:$0]  (!%p1898_p4), %s333_s12, 3072, %s335_s16, %s1936_s1, %s1770_s8, %s1771_s17, %s1772_s24  }
  0x40   : > { %s354_s19 = scalar_lea.vmem [#allocation10], %s1167_s20  ;;  %s1773_s26 = smov [#allocation2]  }
  0x41   : > { %s360_s10 = sshll.u32 %s354_s19, 4  ;;  %s284_s4 = sshll.u32 %s1773_s26, 4  ;;  %s285_s4 = int_to_ptr.vmem [resolvable:$true] %s284_s4  ;;  %s1964_s10 = int_to_ptr.vmem [resolvable:$true] %s360_s10 }
  0x42   : > { %s1774_s27 = smov [#allocation7]   ;;  %s1609_s7 = scalar_lea.vmem %s285_s4, 128 }
  0x43   : > { %s307_s29 = sshll.u32 %s1774_s27, 4  ;;  %p1610_p12 = scmp.ne.s32.totalorder %s285_s4, %s1609_s7  ;;  %s308_s29 = int_to_ptr.vmem [resolvable:$true] %s307_s29 }
  0x44   : > { %p1617_p5 = scmp.lt.s32.totalorder %s285_s4, %s285_s4  ;;  %p1618_p1 = scmp.lt.s32.totalorder %s1609_s7, %s1609_s7 }
  0x45   : > { %p1612_p6 = pnand %p1610_p12, %p1546_p10 }
  0x46   : > { %p1619_p0 = por %p1618_p1, %p1617_p5 }
  0x47   : > { %p1613_p11 = pneg %p1612_p6 }
  0x49   : > { %p1620_p8 = pnand %p1619_p0, %p1613_p11 }
  0x4b   : > { %1623 = shalt.err (!%p1620_p8)
}
  0x4c   : > { %1460 = dma.hbm_to_vmem [thread:$0]  (!%p1904_p2), %s2119_s0, 128, %s285_s4, [#allocation3]  }
  0x4d   : > { %s1635_s27 = scalar_lea.vmem %s308_s29, 1152  ;;  %p1643_p9 = scmp.lt.s32.totalorder %s308_s29, %s308_s29 }
  0x4e   : > { %p1636_p3 = scmp.ne.s32.totalorder %s308_s29, %s1635_s27  ;;  %p1644_p5 = scmp.lt.s32.totalorder %s1635_s27, %s1635_s27 }
  0x50   : > { %p1638_p12 = pnand %p1636_p3, %p1546_p10  ;;  %p1645_p11 = por %p1644_p5, %p1643_p9 }
  0x52   : > { %p1639_p6 = pneg %p1638_p12 }
  0x54   : > { %p1646_p1 = pnand %p1645_p11, %p1639_p6 }
  0x56   : > { %1649 = shalt.err (!%p1646_p1)
}
  0x57   : > { %s1775_s7 = smov 192   ;;  %s1776_s4 = smov 12  }
  0x58   : > { %1466 = dma.hbm_to_vmem [thread:$0]  (!%p1904_p2), %s2121_s2, 1152, %s308_s29, [#allocation6], %s1775_s7, %s1775_s7, %s1776_s4  }
  0x59   : > { %s1663_s14 = scalar_lea.vmem %s1964_s10, 256  ;;  %p2161_p10 = pneg %p1898_p4 }
  0x5a   : > { %p1664_p3 = scmp.ne.s32.totalorder %s1964_s10, %s1663_s14  ;;  %s1777_s25 = smov [#allocation10]  }
  0x5b   : > { %s1668_s19 = sshll.u32 %s1777_s25, 4  ;;  %s1669_s19 = int_to_ptr.vmem [resolvable:$false] %s1668_s19 }
  0x5c   : > { %p1666_p0 = pnand %p1664_p3, %p2161_p10  ;;  %s1670_s26 = scalar_lea.vmem %s1669_s19, 512 }
  0x5d   : > { %p1671_p8 = scmp.lt.s32.totalorder %s1964_s10, %s1669_s19  ;;  %p1672_p12 = scmp.lt.s32.totalorder %s1670_s26, %s1663_s14 }
  0x5e   : > { %p1667_p9 = pneg %p1666_p0 }
  0x5f   : > { %p1673_p6 = por %p1672_p12, %p1671_p8 }
  0x61   : > { %p1674_p5 = pnand %p1673_p6, %p1667_p9 }
  0x63   : > { %1677 = shalt.err (!%p1674_p5)
}
  0x64   : > { %1473 = dma.hbm_to_vmem [thread:$0]  (!%p1898_p4), %s1954_s23, 256, %s1964_s10, %s1936_s1, %s1770_s8, %s1771_s17, %s1772_s24  }
  0x65   : > { %378 = sbr.rel (%p1889_p13) target bundleno = 550 (0x226), region = 52  ;;  %p2162_p2 = scmp.eq.s32.totalorder (!%p1889_p13), %s1857_s11, 0 }
  0x6a   : > { %1729 = dma.done.wait (%p2162_p2), [#allocation3], 128   ;;  %p2163_p11 = pmov %p2162_p2 }
  0x6b   : > { %p2164_p1 = pmov %p2162_p2 }
  0x6c   : > { %1731 = vsyncadd (%p2163_p11), [#allocation3], 4294967168 }
  0x6d   : > { %1733 = dma.done.wait (%p2164_p1), [#allocation6], 1280   ;;  %p2165_p3 = pmov %p2164_p1 }
  0x6e   : > { %s392_s29 = sand.u32 1, %s1857_s11   ;;  %s2000_s1 = sand.u32 1, %s1750_s28  }
  0x6f   : > { %1735 = vsyncadd (%p2165_p3), [#allocation6], 4294966016  ;;  %s1438_s18 = smul.u32 192, %s2000_s1  ;;  %s393_s21 = scalar_lea.sflag [#allocation9], %s392_s29 }
  0x71   : > { %s2003_s22 = scalar_lea.vmem [#allocation8], %s1438_s18 }
  0x72   : > { %1737 = dma.done.wait (%p1874_p7), %s393_s21, 3328  }
  0x73   : > { %1739 = vsyncadd (%p1874_p7), %s393_s21, 4294963968  ;;  %v1778_v0 = vmov 0.0   ;;  %vm1779_vm0 = vmmov 0   ;;  %v465_v1 = vld [vmem:[#allocation7 + $0x3c] sm:$0xff]  ;;  %v463_v2 = vld [vmem:[#allocation7 + $0x30] sm:$0xff]  ;;  %vm503_vm1 = vcmask 392192  }
  0x74   : > { %1376 = vmatprep.subr.mxu1 %v1778_v0  ;;  %571 = vmatprep.mubr.f32.mxu0 %v1778_v0  ;;  %v461_v3 = vld [vmem:[#allocation7 + $0x24] sm:$0xff]  ;;  %v483_v4 = vunpack.c.h.bf16 %v465_v1  ;;  %v482_v5 = vunpack.c.l.bf16 %v465_v1  ;;  %v480_v6 = vunpack.c.h.bf16 %v463_v2  ;;  %v479_v8 = vunpack.c.l.bf16 %v463_v2  ;;  %v459_v9 = vld [vmem:[#allocation7 + $0x18] sm:$0xff]  ;;  %v462_v11 = vld [vmem:[#allocation7 + $0x20] ss:$12 sps:$4 sm:$0xff]   ;;  %s1173_s8 = sshll.u32 %s2000_s1, 4  ;;  %p449_p7 = scmp.lt.s32.totalorder %s1758_s30, 1 }
  0x75   : > { %1388 = vmatprep.mubr.msk.f32.mxu1 %vm1779_vm0, %v1778_v0  ;;  %v466_v7 = vld [vmem:[#allocation7 + $0x38] ss:$12 sps:$4 sm:$0xff]   ;;  %v477_v12 = vunpack.c.h.bf16 %v461_v3  ;;  %v476_v14 = vunpack.c.l.bf16 %v461_v3  ;;  %v457_v15 = vld [vmem:[#allocation7 + $0xc] sm:$0xff]  ;;  %v478_v16 = vunpack.c.h.bf16 %v462_v11  ;;  %v474_v17 = vunpack.c.h.bf16 %v459_v9  ;;  %v458_v18 = vld [vmem:[#allocation7 + $0x8] ss:$12 sps:$4 sm:$0xff]   ;;  %s405_s17 = scalar_lea.vmem [#allocation10], %s1173_s8 }
  0x76   : > { %v484_v10 = vunpack.c.h.bf16 %v466_v7  ;;  %527 = vmatprep.subr.mxu0 %v483_v4  ;;  %v481_v13 = vunpack.c.l.bf16 %v466_v7  ;;  %v473_v19 = vunpack.c.l.bf16 %v459_v9  ;;  %v455_v20 = vld [vmem:[#allocation7] sm:$0xff]  ;;  %v475_v21 = vunpack.c.l.bf16 %v462_v11  ;;  %v485_v31 = vld [vmem:[#allocation2] sm:$0xff]  ;;  %v1301_v34 = vld [vmem:[%s2003_s22 + $0x70] sm:$0xff]   ;;  %s450_s24 = scalar_select %p449_p7, %s1758_s30, 1 }
  0x77   : > { %528 = vmatpush1.msra.mxu0 %v482_v5  ;;  %v471_v22 = vunpack.c.h.bf16 %v457_v15  ;;  %v470_v23 = vunpack.c.l.bf16 %v457_v15  ;;  %v472_v24 = vunpack.c.h.bf16 %v458_v18  ;;  %v468_v25 = vunpack.c.h.bf16 %v455_v20  ;;  %v1302_v26 = vld [vmem:[%s2003_s22 + $0x78] sm:$0xff]   ;;  %v1293_v37 = vld [vmem:[%s2003_s22 + $0x30] sm:$0xff]   ;;  %v1300_v43 = vld [vmem:[%s2003_s22 + $0x68] sm:$0xff]   ;;  %s1174_s16 = sshll.u32 %s2000_s1, 3  ;;  %s2166_s4 = sld [smem:[#allocation25_spill]] }
  0x78   : > { %1377 = vmatpush3.msra.mxu1 %v484_v10  ;;  %529 = vmatprep.subr.mxu0 %v480_v6  ;;  %v467_v27 = vunpack.c.l.bf16 %v455_v20  ;;  %v469_v28 = vunpack.c.l.bf16 %v458_v18  ;;  %v1294_v29 = vld [vmem:[%s2003_s22 + $0x38] sm:$0xff]   ;;  %v1247_v32 = vunpack.c.h.bf16 %v1302_v26  ;;  %v1246_v36 = vunpack.c.l.bf16 %v1302_v26  ;;  %v1309_v38 = vld [vmem:[%s2003_s22 + $0xb0] sm:$0xff]   ;;  %v1292_v46 = vld [vmem:[%s2003_s22 + $0x28] sm:$0xff]   ;;  %s451_s13 = scalar_lea.vmem %s2124_s5, %s450_s24  ;;  %s2167_s20 = sld [smem:[#allocation19_spill]] }
  0x79   : > { %1378 = vmatprep.subr.mxu1 %v1778_v0  ;;  %530 = vmatpush1.msra.mxu0 %v479_v8  ;;  %v1310_v30 = vld [vmem:[%s2003_s22 + $0xb8] sm:$0xff]   ;;  %v1215_v33 = vunpack.c.h.bf16 %v1294_v29  ;;  %v1214_v39 = vunpack.c.l.bf16 %v1294_v29  ;;  %v1243_v41 = vunpack.c.h.bf16 %v1301_v34  ;;  %v1211_v42 = vunpack.c.h.bf16 %v1293_v37  ;;  %v1308_v47 = vld [vmem:[%s2003_s22 + $0xa8] sm:$0xff]   ;;  %v1299_v52 = vld [vmem:[%s2003_s22 + $0x60] sm:$0xff]   ;;  %s1181_s14 = sshll.u32 %s1758_s30, 7  ;;  %s448_s25 = scalar_lea.vmem [#allocation11], %s1174_s16 }
  0x7a   : > { %1379 = vmatpush3.msra.mxu1 %v481_v13  ;;  %531 = vmatprep.subr.mxu0 %v477_v12  ;;  %v1279_v35 = vunpack.c.h.bf16 %v1310_v30  ;;  %v1278_v40 = vunpack.c.l.bf16 %v1310_v30  ;;  %v1275_v44 = vunpack.c.h.bf16 %v1309_v38  ;;  %v1242_v45 = vunpack.c.l.bf16 %v1301_v34  ;;  %v1291_v55 = vld [vmem:[%s2003_s22 + $0x20] sm:$0xff]   ;;  %v1298_v61 = vld [vmem:[%s2003_s22 + $0x58] sm:$0xff]   ;;  %v1297_v7 = vld [vmem:[%s2003_s22 + $0x50] sm:$0xff]   ;;  %s1006_s19 = sshll.u32 %s448_s25, 4  ;;  %s2168_s18 = sld [smem:[#allocation26_spill]]  ;;  %s1007_s19 = int_to_ptr.vmem [resolvable:$true] %s1006_s19 }
  0x7b   : > { %1380 = vmatprep.subr.mxu1 %v1778_v0  ;;  %532 = vmatpush1.msra.mxu0 %v476_v14  ;;  %v1210_v48 = vunpack.c.l.bf16 %v1293_v37  ;;  %v1274_v49 = vunpack.c.l.bf16 %v1309_v38  ;;  %v1239_v50 = vunpack.c.h.bf16 %v1300_v43  ;;  %v1207_v51 = vunpack.c.h.bf16 %v1292_v46  ;;  %v1307_v56 = vld [vmem:[%s2003_s22 + $0xa0] sm:$0xff]   ;;  %v1290_v1 = vld [vmem:[%s2003_s22 + $0x18] sm:$0xff]   ;;  %v1289_v10 = vld [vmem:[%s2003_s22 + $0x10] sm:$0xff]   ;;  %s1678_s11 = scalar_lea.vmem %s1007_s19, 128  ;;  %s1780_s15 = smov [#allocation11]  }
  0x7c   : > { %1381 = vmatpush3.msra.mxu1 %v478_v16  ;;  %533 = vmatprep.subr.mxu0 %v474_v17  ;;  %v1271_v53 = vunpack.c.h.bf16 %v1308_v47  ;;  %v1238_v54 = vunpack.c.l.bf16 %v1300_v43  ;;  %v1206_v57 = vunpack.c.l.bf16 %v1292_v46  ;;  %v1270_v58 = vunpack.c.l.bf16 %v1308_v47  ;;  %v1306_v2 = vld [vmem:[%s2003_s22 + $0x98] sm:$0xff]   ;;  %v1296_v17 = vld [vmem:[%s2003_s22 + $0x48] sm:$0xff]   ;;  %v1305_v18 = vld [vmem:[%s2003_s22 + $0x90] sm:$0xff]   ;;  %p1679_p13 = scmp.ne.s32.totalorder %s1007_s19, %s1678_s11  ;;  %s1682_s30 = sshll.u32 %s1780_s15, 4  ;;  %s1683_s30 = int_to_ptr.vmem [resolvable:$false] %s1682_s30 }
  0x7d   : > { %1382 = vmatprep.subr.mxu1 %v1778_v0  ;;  %534 = vmatpush1.msra.mxu0 %v473_v19  ;;  %v1235_v59 = vunpack.c.h.bf16 %v1299_v52  ;;  %v1203_v60 = vunpack.c.h.bf16 %v1291_v55  ;;  %v1267_v62 = vunpack.c.h.bf16 %v1307_v56  ;;  %v1234_v63 = vunpack.c.l.bf16 %v1299_v52  ;;  %v1295_v26 = vld [vmem:[%s2003_s22 + $0x40] sm:$0xff]   ;;  %s454_s12 = scalar_lea.vmem %s2166_s4, %s450_s24  ;;  %s1684_s8 = scalar_lea.vmem %s1683_s30, 256 }
  0x7e   : > { %1383 = vmatpush3.msra.mxu1 %v475_v21  ;;  %535 = vmatprep.subr.mxu0 %v471_v22  ;;  %v1202_v3 = vunpack.c.l.bf16 %v1291_v55  ;;  %v1266_v4 = vunpack.c.l.bf16 %v1307_v56  ;;  %v1231_v5 = vunpack.c.h.bf16 %v1298_v61  ;;  %v1199_v6 = vunpack.c.h.bf16 %v1290_v1  ;;  %v1288_v21 = vld [vmem:[%s2003_s22 + $0x8] sm:$0xff]   ;;  %v1185_v30 = vld [vmem:[%s2003_s22] sm:$0xff]   ;;  %p2169_p4 = scmp.ne.s32.totalorder %s2167_s20, 0  ;;  %p1685_p9 = scmp.lt.s32.totalorder %s1007_s19, %s1683_s30 }
  0x7f   : > { %1384 = vmatprep.subr.mxu1 %v1778_v0  ;;  %536 = vmatpush1.msra.mxu0 %v470_v23  ;;  %v1263_v8 = vunpack.c.h.bf16 %v1306_v2  ;;  %v1230_v9 = vunpack.c.l.bf16 %v1298_v61  ;;  %v1198_v11 = vunpack.c.l.bf16 %v1290_v1  ;;  %v1262_v12 = vunpack.c.l.bf16 %v1306_v2  ;;  %v1311_v56 = vld [vmem:[%s405_s17 + $0x8] sm:$0xff]   ;;  %p1686_p8 = scmp.lt.s32.totalorder %s1684_s8, %s1678_s11 }
  0x80   : > { %1385 = vmatpush3.msra.mxu1 %v472_v24  ;;  %537 = vmatprep.subr.mxu0 %v468_v25  ;;  %v1227_v13 = vunpack.c.h.bf16 %v1297_v7  ;;  %v1195_v14 = vunpack.c.h.bf16 %v1289_v10  ;;  %v1226_v15 = vunpack.c.l.bf16 %v1297_v7  ;;  %v1194_v16 = vunpack.c.l.bf16 %v1289_v10  ;;  %v1178_v10 = vld [vmem:[%s454_s12] ss:$0 sm:$0xff]  ;;  %s1004_s21 = scalar_lea.hbm %s2168_s18, %s1181_s14  ;;  %p1680_p10 = pnand %p1679_p13, %p2169_p4 }
  0x81   : > { %1386 = vmatprep.subr.mxu1 %v1778_v0  ;;  %538 = vmatpush1.msra.mxu0 %v467_v27  ;;  %v1223_v19 = vunpack.c.h.bf16 %v1296_v17  ;;  %v1259_v20 = vunpack.c.h.bf16 %v1305_v18  ;;  %v1191_v22 = vunpack.c.h.bf16 %v1288_v21  ;;  %v1222_v23 = vunpack.c.l.bf16 %v1296_v17  ;;  %v1304_v27 = vld [vmem:[%s2003_s22 + $0x88] sm:$0xff]   ;;  %p1687_p12 = por %p1686_p8, %p1685_p9 }
  0x82   : > { %1387 = vmatpush3.msra.mxu1 %v469_v28  ;;  %1175 = vmatmul.mubr.msk.f32.vlgmr.msra.gmra.mxu0 %vm503_vm1, %v485_v31  ;;  %v1258_v24 = vunpack.c.l.bf16 %v1305_v18  ;;  %v1190_v25 = vunpack.c.l.bf16 %v1288_v21  ;;  %v1219_v28 = vunpack.c.h.bf16 %v1295_v26  ;;  %v1255_v29 = vunpack.c.h.bf16 %v1304_v27  ;;  %p1681_p0 = pneg %p1680_p10 }
  0x83   : > { %1389 = vmatmul.mubr.msk.f32.vlgmr.msra.gmra.mxu1 %vm503_vm1, %v485_v31  ;;  %1319 = vmatprep.subr.mxu0 %v1247_v32  ;;  %v1187_v31 = vunpack.c.h.bf16 %v1185_v30  ;;  %v1218_v32 = vunpack.c.l.bf16 %v1295_v26  ;;  %v1186_v34 = vunpack.c.l.bf16 %v1185_v30  ;;  %v488_v38 = vlaneseq }
  0x84   : > { %1391 = vmatprep.subr.mxu1 %v1778_v0  ;;  %1320 = vmatpush3.msra.mxu0 %v1215_v33  ;;  %v1254_v33 = vunpack.c.l.bf16 %v1304_v27  ;;  %vm914_vm2 = vcmask 261120   ;;  %p1688_p6 = pnand %p1687_p12, %p1681_p0 }
  0x85   : > { %1392 = vmatpush3.msra.mxu1 %v1279_v35  ;;  %1321 = vmatprep.subr.mxu0 %v1246_v36  ;;  %v1303_v35 = vld [vmem:[%s2003_s22 + $0x80] sm:$0xff]   ;;  %s991_s22 = scalar_lea.sflag [#allocation4], %s2000_s1 }
  0x86   : > { %1393 = vmatprep.subr.mxu1 %v1778_v0  ;;  %1322 = vmatpush3.msra.mxu0 %v1214_v39  ;;  %v1251_v36 = vunpack.c.h.bf16 %v1303_v35  ;;  %v1250_v37 = vunpack.c.l.bf16 %v1303_v35  ;;  %v489_v39 = vshrl.u32 %v488_v38, 7 }
  0x87   : > { %1394 = vmatpush3.msra.mxu1 %v1278_v40  ;;  %1323 = vmatprep.subr.mxu0 %v1243_v41 }
  0x88   : > { %1395 = vmatprep.subr.mxu1 %v1778_v0  ;;  %1324 = vmatpush3.msra.mxu0 %v1211_v42  ;;  %v490_v40 = vsub.s32 0, %v489_v39  ;;  %v498_v41 = vsub.s32 2, %v489_v39  ;;  %v486_v42 = vld [vmem:[%s2122_s3] sm:$0x7]  ;;  %v494_v43 = vsub.s32 1, %v489_v39 }
  0x89   : > { %1396 = vmatpush3.msra.mxu1 %v1275_v44  ;;  %1325 = vmatprep.subr.mxu0 %v1242_v45 }
  0x8a   : > { %1397 = vmatprep.subr.mxu1 %v1778_v0  ;;  %1326 = vmatpush3.msra.mxu0 %v1210_v48  ;;  %v491_v44 = vrot.slane %v486_v42, %v490_v40  ;;  %v499_v45 = vrot.slane %v486_v42, %v498_v41  ;;  %v495_v46 = vrot.slane %v486_v42, %v494_v43 }
  0x8b   : > { %1398 = vmatpush3.msra.mxu1 %v1274_v49  ;;  %1327 = vmatprep.subr.mxu0 %v1239_v50 }
  0x8c   : > { %1399 = vmatprep.subr.mxu1 %v1778_v0  ;;  %1328 = vmatpush3.msra.mxu0 %v1207_v51 }
  0x8d   : > { %1400 = vmatpush3.msra.mxu1 %v1271_v53  ;;  %1329 = vmatprep.subr.mxu0 %v1238_v54 }
  0x8e   : > { %1401 = vmatprep.subr.mxu1 %v1778_v0  ;;  %1330 = vmatpush3.msra.mxu0 %v1206_v57 }
  0x8f   : > { %1402 = vmatpush3.msra.mxu1 %v1270_v58  ;;  %1331 = vmatprep.subr.mxu0 %v1235_v59 }
  0x90   : > { %1403 = vmatprep.subr.mxu1 %v1778_v0  ;;  %1332 = vmatpush3.msra.mxu0 %v1203_v60  ;;  %v1287_v60 = vunpack.c.h.bf16 %v1311_v56 }
  0x91   : > { %1404 = vmatpush3.msra.mxu1 %v1267_v62  ;;  %1333 = vmatprep.subr.mxu0 %v1234_v63  ;;  %v1281_v62 = vld [vmem:[%s405_s17] sm:$0xff]   ;;  %v1286_v63 = vunpack.c.l.bf16 %v1311_v56 }
  0x92   : > { %1405 = vmatprep.subr.mxu1 %v1778_v0  ;;  %1334 = vmatpush3.msra.mxu0 %v1202_v3  ;;  %v1283_v1 = vunpack.c.h.bf16 %v1281_v62  ;;  %v1282_v2 = vunpack.c.l.bf16 %v1281_v62  ;;  %v906_v3 = vld [vmem:[#allocation5] sm:$0xff] }
  0x93   : > { %1406 = vmatpush3.msra.mxu1 %v1266_v4  ;;  %1335 = vmatprep.subr.mxu0 %v1231_v5 }
  0x94   : > { %1407 = vmatprep.subr.mxu1 %v1778_v0  ;;  %1336 = vmatpush3.msra.mxu0 %v1199_v6 }
  0x95   : > { %1408 = vmatpush3.msra.mxu1 %v1263_v8  ;;  %1337 = vmatprep.subr.mxu0 %v1230_v9  ;;  %v1177_v8 = vld [vmem:[%s451_s13] ss:$0 sm:$0xff] }
  0x96   : > { %1409 = vmatprep.subr.mxu1 %v1778_v0  ;;  %1338 = vmatpush3.msra.mxu0 %v1198_v11 }
  0x97   : > { %1410 = vmatpush3.msra.mxu1 %v1262_v12  ;;  %1339 = vmatprep.subr.mxu0 %v1227_v13 }
  0x98   : > { %1411 = vmatprep.subr.mxu1 %v1778_v0  ;;  %1340 = vmatpush3.msra.mxu0 %v1195_v14 }
  0x99   : > { %1423 = vmatprep.mubr.msk.f32.mxu1 %vm1779_vm0, %v1778_v0  ;;  %1341 = vmatprep.subr.mxu0 %v1226_v15 }
  0x9a   : > { %1342 = vmatpush3.msra.mxu0 %v1194_v16  ;;  %1412 = vmatpush3.msra.mxu1 %v1259_v20 }
  0x9b   : > { %1343 = vmatprep.subr.mxu0 %v1223_v19  ;;  %1413 = vmatprep.subr.mxu1 %v1778_v0 }
  0x9c   : > { %1344 = vmatpush3.msra.mxu0 %v1191_v22  ;;  %1414 = vmatpush3.msra.mxu1 %v1258_v24 }
  0x9d   : > { %1345 = vmatprep.subr.mxu0 %v1222_v23  ;;  %1415 = vmatprep.subr.mxu1 %v1778_v0 }
  0x9e   : > { %1346 = vmatpush3.msra.mxu0 %v1190_v25  ;;  %1416 = vmatpush3.msra.mxu1 %v1255_v29 }
  0x9f   : > { %1347 = vmatprep.subr.mxu0 %v1219_v28  ;;  %1417 = vmatprep.subr.mxu1 %v1778_v0 }
  0xa0   : > { %1348 = vmatpush3.msra.mxu0 %v1187_v31  ;;  %1418 = vmatpush3.msra.mxu1 %v1254_v33 }
  0xa1   : > { %1349 = vmatprep.subr.mxu0 %v1218_v32  ;;  %1419 = vmatprep.subr.mxu1 %v1778_v0 }
  0xa2   : > { %1350 = vmatpush3.msra.mxu0 %v1186_v34  ;;  %1420 = vmatpush3.msra.mxu1 %v1251_v36 }
  0xa3   : > { %1426 = vmatprep.subr.mxu0 %v1778_v0  ;;  %1421 = vmatprep.subr.mxu1 %v1778_v0 }
  0xa4   : > { %1422 = vmatpush3.msra.mxu1 %v1250_v37 }
 0x142   : > { %v573_v47 = vpop.f32.mrf.mxu0 }
 0x143   : > { %v644_v48 = vpop.f32.mrf.mxu1  ;;  %v574_v49 = vadd.f32 %v573_v47, %v491_v44 }
 0x144   : > { %v645_v50 = vadd.f32 %v644_v48, %v499_v45  ;;  %v575_v51 = vpop.f32.mrf.mxu0 }
 0x145   : > { %v1390_v52 = vpop.f32.mrf.mxu1  ;;  %v576_v53 = vadd.f32 %v575_v51, %v495_v46  ;;  %v648_v55 = vmul.f32 0.2, %v574_v49 }
 0x146   : > { %v650_v54 = vmul.f32 0.2, %v645_v50 }
 0x147   : > { %v649_v57 = vmul.f32 0.2, %v576_v53  ;;  %v651_v61 = vmax.f32 %v574_v49, %v648_v55 }
 0x148   : > { %v653_v58 = vmax.f32 %v645_v50, %v650_v54 }
 0x149   : > { %v652_v59 = vmax.f32 %v576_v53, %v649_v57 }
 0x14a   : > { %1424 = vmatmul.mubr.f32.vlgmr.msra.gmra.mxu1 %v653_v58 }
 0x14b   : > { %821 = vmatprep.mubr.f32.mxu0 %v652_v59 }
 0x14c   : > { %822 = vmatmul.mubr.f32.vlgmr.msra.gmra.mxu0 %v651_v61 }
 0x14d   : > { %1427 = vmatpush3.msra.mxu0 %v1287_v60  ;;  %1434 = vmatprep.mubr.msk.f32.mxu0 %vm1779_vm0, %v1778_v0 }
 0x14e   : > { %1428 = vmatprep.subr.mxu0 %v1778_v0 }
 0x14f   : > { %1429 = vmatpush3.msra.mxu0 %v1286_v63 }
 0x150   : > { %1430 = vmatprep.subr.mxu0 %v1778_v0 }
 0x151   : > { %1431 = vmatpush3.msra.mxu0 %v1283_v1 }
 0x152   : > { %1432 = vmatprep.subr.mxu0 %v1778_v0 }
 0x153   : > { %1433 = vmatpush3.msra.mxu0 %v1282_v2 }
 0x154   : > { %1435 = vmatmul.mubr.msk.f32.vlgmr.msra.gmra.mxu0 %vm914_vm2, %v906_v3 }
 0x20a   : > { %v893_v4 = vpop.f32.mrf.mxu1 }
 0x20c   : > { %v1425_v5 = vpop.f32.mrf.mxu1  ;;  %v1351_v6 = vpop.f32.mrf.mxu0 }
 0x20e   : > { %v1352_v7 = vpop.f32.mrf.mxu0 }
 0x20f   : > { %v1353_v9 = vadd.f32 %v1352_v7, %v1351_v6 }
 0x211   : > { %v824_v0 = vadd.f32 %v1353_v9, %v1177_v8 }
 0x213   : > { %v894_v11 = vadd.f32 %v893_v4, %v824_v0 }
 0x214   : > { %v984_v12 = vpop.f32.mrf.mxu0 }
 0x215   : > { %v897_v13 = vmax.f32 %v894_v11, 0.0  ;;  %v985_v14 = vadd.f32 %v1178_v10, %v984_v12 }
 0x216   : > { %v1436_v15 = vpop.f32.mrf.mxu0 }
 0x217   : > { %v988_v16 = vadd.f32 %v985_v14, %v897_v13 }
 0x219   : > { %989 = vst [vmem:[%s448_s25] sm:$0xff] %v988_v16 }
 0x21a   : > { %1691 = shalt.err (!%p1688_p6)
}
 0x21b   : > { %s1692_s17 = scalar_lea.hbm %s1004_s21, 128  ;;  %s1696_s23 = scalar_lea.hbm %s2168_s18, 256 }
 0x21c   : > { %p1693_p5 = scmp.ne.s32.totalorder %s1004_s21, %s1692_s17  ;;  %p1697_p1 = scmp.lt.s32.totalorder %s1004_s21, %s2168_s18 }
 0x21d   : > { %p1698_p3 = scmp.lt.s32.totalorder %s1696_s23, %s1692_s17 }
 0x21e   : > { %p1694_p2 = pnand %p1693_p5, %p2169_p4 }
 0x21f   : > { %p1699_p7 = por %p1698_p3, %p1697_p1 }
 0x220   : > { %p1695_p11 = pneg %p1694_p2 }
 0x222   : > { %p1700_p13 = pnand %p1699_p7, %p1695_p11 }
 0x224   : > { %1703 = shalt.err (!%p1700_p13)
}
 0x225   : > { %1455 = dma.vmem_to_hbm [thread:$0]  (%p2169_p4), %s1007_s19, 128, %s1004_s21, %s991_s22  }
 0x226 PF: > { %s2170_s16 = sld [smem:[#allocation16_spill]] }
 0x227   : > { %s2171_s27 = sld [smem:[#allocation20_spill]] }
 0x228   : > { %s2172_s7 = sld [smem:[#allocation18_spill]] }
 0x22c   : > { %s1018_s4 = sand.u32 1, %s2170_s16  }
 0x22d   : > { %p2173_p10 = scmp.ne.s32.totalorder %s2171_s27, 0  ;;  %s1019_s12 = scalar_lea.sflag [#allocation4], %s1018_s4 }
 0x22e   : > { %p2174_p0 = scmp.ge.s32.totalorder %s2172_s7, 2 }
 0x230   : > { %p1475_p9 = pnand %p2174_p0, %p2173_p10 }
 0x232   : > { %p1476_p8 = pneg %p1475_p9 }
 0x234   : > { %1741 = dma.done.wait (%p1476_p8), %s1019_s12, 128  }
 0x235   : > { %1743 = vsyncadd (%p1476_p8), %s1019_s12, 4294967168  ;;  %s26_s10 = sadd.s32 1, %s2172_s7   ;;  %s2175_s14 = sld [smem:[#allocation17_spill]] }
 0x236   : > { %p23_p12 = scmp.ge.s32.totalorder %s26_s10, 4   ;;  %s2176_s29 = sld [smem:[#allocation22_spill]] }
 0x237   : > { %s2177_s20 = sld [smem:[#allocation21_spill]]  ;;  %s2178_s27 = smov %s1750_s28 }
 0x238   : > { %s2180_s30 = smov %s1762_s9 }
 0x239   :  { %25 = sbr.rel (!%p23_p12) target bundleno = 13 (0xd), region = 129 }
 0x23b   : > { %s2179_s28 = smov %s2175_s14 }
 0x23d   : > { %s2181_s9 = smov %s2177_s20 }
 0x23e   :  { %1024 = vsyncpa [#allocation3], 1 }
 0x23f   :  { %1026 = vsyncpa [#allocation3 + $0x1], 1 }
 0x240   :  { %1027 = vsyncpa [#allocation6], 1 }
 0x241   :  { %1028 = vsyncpa [#allocation9], 1 }
 0x242   :  { %1030 = vsyncpa [#allocation9 + $0x1], 1 }
 0x243   :  { %1031 = vsyncpa [#allocation4], 1 }
 0x244   :  { %1033 = vsyncpa [#allocation4 + $0x1], 1 }

</bundles_post_ra>
